<compile_context>
chip_gen: v7x
topology: tpu7x:2x2x1
jax: 0.10.0
libtpu: 0.0.40
codegen_flags: <defaults>
</compile_context>

<pallas_src>
import functools

import jax
import jax.numpy as jnp
from jax.experimental import pallas as pl
from jax.experimental.pallas import tpu as pltpu


def _round_up(x: int, m: int) -> int:
    return ((x + m - 1) // m) * m


def _vl_kernel_single_k(x_ref, w_ref, b_ref, o_ref):
    # Single reduction step: no accumulator scratch; write the tile directly.
    o_ref[...] = (
        jnp.dot(x_ref[...], w_ref[...], preferred_element_type=jnp.float32)
        + b_ref[...]
    ).astype(o_ref.dtype)


def _vl_kernel_multi_k(x_ref, w_ref, b_ref, o_ref, acc_ref):
    # Fallback path for K larger than max_block_k.
    k = pl.program_id(2)

    @pl.when(k == 0)
    def _():
        acc_ref[...] = jnp.zeros_like(acc_ref)

    acc_ref[...] += jnp.dot(
        x_ref[...], w_ref[...], preferred_element_type=jnp.float32
    )

    @pl.when(k == pl.num_programs(2) - 1)
    def _():
        o_ref[...] = (acc_ref[...] + b_ref[...]).astype(o_ref.dtype)


@functools.partial(
    jax.jit, static_argnames=("n_out", "block_m", "block_n", "block_k")
)
def _value_layer_padded(x, w_pad, b_pad, *, n_out, block_m, block_n, block_k):
    """y = x @ w_pad[:D, :n_out] + b_pad[0, :n_out] (tiled MXU matmul).

    w_pad: (K_pad, N_pad) bf16, pre-padded/cast once off the hot path.
    b_pad: (1, N_pad) f32.
    """
    B, S, D = x.shape
    K_pad, N_pad = w_pad.shape
    M = B * S

    bn = block_n
    bk = block_k
    # Small-M (decode-like) calls: pad M only to the bf16 sublane multiple
    # (16), not 128, to avoid 8x wasted MXU work / output writeback.
    bm = min(block_m, _round_up(M, 16))
    M_pad = _round_up(M, bm)

    x2d = x.reshape(M, D).astype(jnp.bfloat16)
    if M_pad != M or K_pad != D:
        x2d = jnp.pad(x2d, ((0, M_pad - M), (0, K_pad - D)))

    # Grid (n, m, k): k innermost (reduction); with bk = K the weight block
    # index (0, j) is constant across the whole m loop -> fetched once per
    # N tile. x is re-streamed only N_pad/bn times (outermost axis).
    grid = (N_pad // bn, M_pad // bm, K_pad // bk)
    multi_k = grid[2] > 1
    kernel = _vl_kernel_multi_k if multi_k else _vl_kernel_single_k
    scratch = [pltpu.VMEM((bm, bn), jnp.float32)] if multi_k else []

    out_bytes = jnp.dtype(x.dtype).itemsize
    vmem_needed = 2 * (bm * bk * 2 + bk * bn * 2 + bn * 4 + bm * bn * out_bytes)
    if multi_k:
        vmem_needed += bm * bn * 4
    # Cap at 48 MiB: leaves headroom on v7x (64 MiB physical per TensorCore)
    # while still letting v5e/v6e take large K/N tiles.
    vmem_limit = min(48 * 1024 * 1024, max(2 * vmem_needed, 16 * 1024 * 1024))

    out2d = pl.pallas_call(
        kernel,
        out_shape=jax.ShapeDtypeStruct((M_pad, N_pad), x.dtype),
        grid_spec=pltpu.PrefetchScalarGridSpec(
            num_scalar_prefetch=0,
            grid=grid,
            in_specs=[
                pl.BlockSpec((bm, bk), lambda j, i, k: (i, k)),  # x tile
                pl.BlockSpec((bk, bn), lambda j, i, k: (k, j)),  # weight tile
                pl.BlockSpec((1, bn), lambda j, i, k: (0, j)),   # bias tile
            ],
            out_specs=pl.BlockSpec((bm, bn), lambda j, i, k: (i, j)),
            scratch_shapes=scratch,
        ),
        compiler_params=pltpu.CompilerParams(
            dimension_semantics=("parallel", "parallel", "arbitrary"),
            vmem_limit_bytes=vmem_limit,
        ),
    )(x2d, w_pad, b_pad)

    return out2d[:M, :n_out].reshape(B, S, n_out)


def make_value_layer(weight_t, bias, *, block_m=256, block_n=1024,
                     max_block_k=4096):
    """Build the ValueLayer forward: y = x @ weight_t + bias.

    weight_t: (d_model, d_model * n_heads)  (PyTorch linear.weight transposed)
    bias:     (d_model * n_heads,)

    The weight cast (f32 -> bf16) and padding happen ONCE here, outside the
    per-call hot path, so each forward call streams only the bf16 weight.
    """
    K, N = weight_t.shape
    assert bias.shape == (N,)

    bn = min(block_n, _round_up(N, 128))
    bk = K if K <= max_block_k else max_block_k  # prefer single reduction step
    N_pad = _round_up(N, bn)
    K_pad = _round_up(K, bk)

    w_pad = weight_t.astype(jnp.bfloat16)
    if K_pad != K or N_pad != N:
        w_pad = jnp.pad(w_pad, ((0, K_pad - K), (0, N_pad - N)))
    b_pad = bias.astype(jnp.float32).reshape(1, N)
    if N_pad != N:
        b_pad = jnp.pad(b_pad, ((0, 0), (0, N_pad - N)))
    w_pad = jax.device_put(w_pad)
    b_pad = jax.device_put(b_pad)

    def forward(x):
        return _value_layer_padded(
            x, w_pad, b_pad,
            n_out=N, block_m=block_m, block_n=bn, block_k=bk,
        )

    return forward


if __name__ == "__main__":
    # Small shapes consistent with the module's forward pass.
    d_model = 32
    n_heads = 4
    batch, seq = 2, 8

    key = jax.random.PRNGKey(0)
    kx, kw, kb = jax.random.split(key, 3)

    # PyTorch-like uniform(-1/sqrt(D), 1/sqrt(D)) init; weight stored (out, in),
    # we keep the transposed (in, out) layout for a row-major matmul.
    bound = 1.0 / (d_model ** 0.5)
    weight = jax.random.uniform(
        kw, (d_model * n_heads, d_model), jnp.float32, -bound, bound
    )
    bias = jax.random.uniform(
        kb, (d_model * n_heads,), jnp.float32, -bound, bound
    )
    weight_t = weight.T  # (d_model, d_model * n_heads)

    x = jax.random.normal(kx, (batch, seq, d_model), jnp.float32)

    value_layer = make_value_layer(weight_t, bias)
    y = value_layer(x)
    y = jax.block_until_ready(y)
    assert y.shape == (batch, seq, d_model * n_heads)

    # Reference: same bf16-in / f32-accumulate numerics as the kernel.
    M = batch * seq
    y_ref = (
        jnp.dot(
            x.reshape(M, d_model).astype(jnp.bfloat16),
            weight_t.astype(jnp.bfloat16),
            preferred_element_type=jnp.float32,
        )
        + bias
    ).reshape(batch, seq, d_model * n_heads)
    assert jnp.allclose(y, y_ref, atol=2e-3, rtol=2e-3)

    # Sanity check against full-f32 math (loose tol for the bf16 input cast).
    y_f32 = x @ weight_t + bias
    assert jnp.allclose(y, y_f32, atol=5e-2, rtol=5e-2)

    print("KERNEL_OK")
</pallas_src>

<mosaic_0001>
module attributes {stable_mosaic.version = 11 : i64} {
  func.func @_vl_kernel_single_k(%arg0: i32, %arg1: i32, %arg2: i32, %arg3: memref<16x32xbf16, #tpu.memory_space<vmem>>, %arg4: memref<32x128xbf16, #tpu.memory_space<vmem>>, %arg5: memref<1x128xf32, #tpu.memory_space<vmem>>, %arg6: memref<16x128xf32, #tpu.memory_space<vmem>>) attributes {dimension_semantics = [#tpu.dimension_semantics<parallel>, #tpu.dimension_semantics<parallel>, #tpu.dimension_semantics<arbitrary>], iteration_bounds = array<i64: 1, 1, 1>, scalar_prefetch = 0 : i64, scratch_operands = 0 : i64, tpu.core_type = #tpu.core_type<tc>, window_params = [{transform_indices = @transform_0, window_bounds = array<i64: 16, 32>}, {transform_indices = @transform_1, window_bounds = array<i64: 32, 128>}, {transform_indices = @transform_2, window_bounds = array<i64: 1, 128>}, {transform_indices = @transform_3, window_bounds = array<i64: 16, 128>}]} {
    %c0 = arith.constant 0 : index
    %c0_0 = arith.constant 0 : index
    %0 = vector.load %arg3[%c0, %c0_0] : memref<16x32xbf16, #tpu.memory_space<vmem>>, vector<16x32xbf16>
    %c0_1 = arith.constant 0 : index
    %c0_2 = arith.constant 0 : index
    %1 = vector.load %arg4[%c0_1, %c0_2] : memref<32x128xbf16, #tpu.memory_space<vmem>>, vector<32x128xbf16>
    %cst = arith.constant dense<0.000000e+00> : vector<16x128xf32>
    %2 = tpu.matmul %0, %1, %cst {dimension_numbers = #tpu.dot_dimension_numbers<[1], [0], [0], [1], [0, 0, 1, 1], [], []>} : vector<16x32xbf16>, vector<32x128xbf16>, vector<16x128xf32> -> vector<16x128xf32>
    %c0_3 = arith.constant 0 : index
    %c0_4 = arith.constant 0 : index
    %3 = vector.load %arg5[%c0_3, %c0_4] : memref<1x128xf32, #tpu.memory_space<vmem>>, vector<1x128xf32>
    %4 = vector.broadcast %3 : vector<1x128xf32> to vector<16x128xf32>
    %5 = arith.addf %2, %4 : vector<16x128xf32>
    %c0_5 = arith.constant 0 : index
    %c0_6 = arith.constant 0 : index
    %6 = vector.load %arg6[%c0_5, %c0_6] : memref<16x128xf32, #tpu.memory_space<vmem>>, vector<16x128xf32>
    tpu.vector_store %arg6[%c0_5, %c0_6], %5 {strides = array<i32>} : memref<16x128xf32, #tpu.memory_space<vmem>>, vector<16x128xf32>,
    return
  }
  func.func @transform_0(%arg0: i32, %arg1: i32, %arg2: i32) -> (i32, i32) {
    %c0_i32 = arith.constant 0 : i32
    return %arg1, %arg2 : i32, i32
  }
  func.func @transform_1(%arg0: i32, %arg1: i32, %arg2: i32) -> (i32, i32) {
    %c0_i32 = arith.constant 0 : i32
    return %arg2, %arg0 : i32, i32
  }
  func.func @transform_2(%arg0: i32, %arg1: i32, %arg2: i32) -> (i32, i32) {
    %c0_i32 = arith.constant 0 : i32
    %c0_i32_0 = arith.constant 0 : i32
    return %c0_i32, %arg0 : i32, i32
  }
  func.func @transform_3(%arg0: i32, %arg1: i32, %arg2: i32) -> (i32, i32) {
    %c0_i32 = arith.constant 0 : i32
    return %arg1, %arg0 : i32, i32
  }
}

</mosaic_0001>

<bundles_post_ra>
// kernel: _value_layer_padded.1
= control target key start
LH: loop header
LB: loop body
LE: loop exit
PB: predicated region body
PF: predicated region fallthrough
CT: control target
= control target key end

     0   :  { %v157_v1 = vmov 0.0   ;;  %vm158_vm0 = vmmov 0   ;;  %s206_s0 = inlined_call_operand.vmem [shape: bf16[16,32], index: 0, kind: input, shape index: {}]   ;;  %s207_s1 = inlined_call_operand.vmem [shape: bf16[32,128], index: 1, kind: input, shape index: {}]   ;;  %s208_s2 = inlined_call_operand.vmem [shape: f32[1,128], index: 2, kind: input, shape index: {}]   ;;  %s209_s3 = inlined_call_operand.hbm [shape: f32[16,128], index: 3, kind: output, shape index: {}]  }
   0x1   :  { %v130_v0 = vld [vmem:[%s207_s1] sm:$0xff]   ;;  %117 = vmatprep.subr.bf16.mxu0 %v157_v1  ;;  %v131_v2 = vld [vmem:[%s207_s1 + $0x8] sm:$0xff]   ;;  %121 = vmatprep.mubr.msk.bf16.mxu0 %vm158_vm0, %v157_v1 }
   0x2   :  { %118 = vmatpush3.bf16.msra.mxu0 %v130_v0 }
   0x3   :  { %119 = vmatprep.subr.bf16.mxu0 %v157_v1 }
   0x4   :  { %8 = vsyncpa [#allocation3], 0  ;;  %v132_v3 = vld [vmem:[%s206_s0] sm:$0xff]   ;;  %vm46_vm1 = vcmask 261120   ;;  %s159_s20 = smov [#allocation2]  }
   0x5   :  { %v109_v4 = vld [vmem:[%s208_s2] ss:$0 sm:$0xff]  ;;  %s98_s21 = sshll.u32 %s159_s20, 4  ;;  %s99_s21 = int_to_ptr.vmem [resolvable:$true] %s98_s21 }
   0x6   :  { %120 = vmatpush3.bf16.msra.mxu0 %v131_v2  ;;  %s133_s1 = scalar_lea.vmem %s99_s21, 256  ;;  %p138_p1 = scmp.lt.s32.totalorder %s99_s21, %s99_s21 }
   0x7   :  { %p134_p0 = scmp.ne.s32.totalorder %s99_s21, %s133_s1  ;;  %p139_p2 = scmp.lt.s32.totalorder %s133_s1, %s133_s1 }
   0x9   :  { %122 = vmatmul.mubr.msk.bf16.vlgmr.msra.gmra.mrb[0].mxu0 %vm46_vm1, %v132_v3  ;;  %p140_p3 = por %p139_p2, %p138_p1 }
   0xb   :  { %p141_p4 = pnand %p140_p3, %p134_p0 }
  0xdc   :  { %v84_v5 = vpop.f32.mrb[0].mxu0 }
  0xdd   :  { %v85_v6 = vadd.f32 %v109_v4, %v84_v5  ;;  %v123_v7 = vpop.f32.mrb[1].mxu0 }
  0xde   :  { %v87_v8 = vpop.f32.mrb[2].mxu0 }
  0xdf   :  { %91 = vst [vmem:[#allocation2] sm:$0xff] %v85_v6  ;;  %v88_v9 = vadd.f32 %v109_v4, %v87_v8  ;;  %v124_v10 = vpop.f32.mrb[3].mxu0 }
  0xe1   :  { %92 = vst [vmem:[#allocation2 + $0x8] sm:$0xff] %v88_v9 }
  0xe2   :  { %144 = shalt.err (!%p141_p4)
}
  0xe3   :  { %s145_s22 = scalar_lea.hbm %s209_s3, 256 }
  0xe4   :  { %p146_p5 = scmp.ne.s32.totalorder %s209_s3, %s145_s22  ;;  %p149_p6 = scmp.lt.u32.totalorder %s145_s22, %s209_s3 }
  0xe6   :  { %p151_p7 = pnand %p149_p6, %p146_p5 }
  0xe8   :  { %154 = shalt.err (!%p151_p7)
}
  0xe9   :  { %s160_s27 = smov 128   ;;  %s161_s28 = smov 8  }
  0xea   :  { %104 = dma.vmem_to_hbm [thread:$0]  %s99_s21, 256, %s209_s3, [#allocation3], %s160_s27, %s160_s27, %s161_s28  }
  0xeb   :  { %155 = dma.done.wait [#allocation3], 256  }
  0xec   :  { %156 = vsyncadd [#allocation3], 4294967040 }
  0xed   :  { %108 = vsyncpa [#allocation3], 1 }

</bundles_post_ra>
